<compile_context>
chip_gen: v5e
topology: v5e:2x2
jax: 0.10.0
libtpu: 0.0.40
codegen_flags: <defaults>
</compile_context>

<pallas_src>
import functools

import jax
import jax.numpy as jnp
from jax.experimental import pallas as pl
from jax.experimental.pallas import tpu as pltpu


def _width_pool_matrix(W, fs):
    """(W, W//fs) averaging matrix carrying the full 1/fs^2 AvgPool2d factor (host-built)."""
    w = jnp.arange(W)[:, None]
    q = jnp.arange(W // fs)[None, :]
    return jnp.where((w // fs) == q, 1.0 / (fs * fs), 0.0).astype(jnp.float32)


def _se_kernel(x_ref, aw_ref, w1_ref, b1_ref, w2_ref, b2_ref, o_ref, *,
               slabs, H, W, fs, n_channels, hidden):
    # x_ref:  (slabs*H, W)        slabs = Nb*C ; rows are (slab, h) pairs, h fastest
    # aw_ref: (W, W//fs)          hoisted width-pool matrix (carries 1/fs^2)
    # w1_ref: (n_channels, hidden)  squeeze weight, transposed to (in, out)
    # b1_ref: (1, hidden)
    # w2_ref: (hidden, n_channels)  excite weight, transposed to (in, out)
    # b2_ref: (1, n_channels)
    # o_ref:  (slabs, H, n_channels)
    Hp = H // fs
    Mh = slabs * Hp

    # --- AvgPool2d(frame_size) -------------------------------------------------
    # H direction: sublane-group sum via fs strided row-slices of the input ref
    # (replaces the old O((C*H)^2) pooling-matrix matmul).
    xh = x_ref[pl.ds(0, Mh, stride=fs), :]
    for r in range(1, fs):
        xh = xh + x_ref[pl.ds(r, Mh, stride=fs), :]
    # W direction: lane-dim reduction -> one MXU matmul with the hoisted matrix.
    pooled = jnp.dot(xh, aw_ref[...], preferred_element_type=jnp.float32)   # (Mh, n_channels)

    # --- squeeze: Linear + ReLU (single tall-M GEMM over all folded slabs) ------
    s = jnp.dot(pooled, w1_ref[...], preferred_element_type=jnp.float32) + b1_ref[...]
    s = jnp.maximum(s, 0.0)                                                  # (Mh, hidden)

    # --- excite: Linear + Sigmoid (exp lands on the EUP slot) -------------------
    z = jnp.dot(s, w2_ref[...], preferred_element_type=jnp.float32) + b2_ref[...]
    # approx=True (EUP reciprocal) was evaluated but its ~1e-3-scale error breaks
    # the 1e-4 parity check; the divide is tiny, so full precision is kept.
    gate = pl.reciprocal(1.0 + jnp.exp(-z), approx=False)                    # (Mh, n_channels)

    # --- final torch.matmul(in_block, gate), batched over the Nb*C slabs --------
    gate3 = gate.reshape(slabs, Hp, n_channels)     # Hp == W (leading-dim split only)
    x3 = x_ref[...].reshape(slabs, H, W)            # leading-dim split only
    out = jnp.einsum('bhw,bwn->bhn', x3, gate3,
                     preferred_element_type=jnp.float32)                     # (slabs, H, n_channels)
    o_ref[...] = out.astype(o_ref.dtype)


def squeeze_excite_forward(in_block, w1, b1, w2, b2, frame_size, *,
                           block_bytes_budget=4 * 1024 * 1024):
    """in_block: (N, C, H, W) f32; w1: (hidden, n_channels); w2: (n_channels, hidden)."""
    N, C, H, W = in_block.shape
    hidden, n_channels = w1.shape
    fs = frame_size
    assert H % fs == 0 and W % fs == 0, "spatial dims must be divisible by frame_size"
    assert W // fs == n_channels, "pooled width must equal Linear in_features (n_channels)"
    assert H // fs == W, "torch.matmul(in_block, gate) requires W == pooled height"
    assert w2.shape == (n_channels, hidden)

    # --- choose how many batch elements to fold into each grid step -------------
    per_batch_bytes = (C * H * W + C * H * n_channels) * 4        # in block + out block
    nb = 1
    for cand in range(1, N + 1):
        if N % cand:
            continue
        if N >= 2 and N // cand < 2:      # keep >=2 grid steps so both v7x TCs get work
            continue
        if cand * per_batch_bytes > block_bytes_budget:
            continue
        nb = cand
    grid = (N // nb,)
    slabs = nb * C

    # --- host-side (free) reshapes + hoisted constants --------------------------
    x2d = in_block.astype(jnp.float32).reshape(N * C * H, W)
    a_w = _width_pool_matrix(W, fs)                                # (W, n_channels)
    w1t = jnp.transpose(w1).astype(jnp.float32)                    # (n_channels, hidden)
    w2t = jnp.transpose(w2).astype(jnp.float32)                    # (hidden, n_channels)
    b1r = b1.reshape(1, hidden).astype(jnp.float32)
    b2r = b2.reshape(1, n_channels).astype(jnp.float32)

    kernel = functools.partial(_se_kernel, slabs=slabs, H=H, W=W, fs=fs,
                               n_channels=n_channels, hidden=hidden)

    out = pl.pallas_call(
        kernel,
        out_shape=jax.ShapeDtypeStruct((N * C, H, n_channels), jnp.float32),
        grid_spec=pltpu.PrefetchScalarGridSpec(
            num_scalar_prefetch=0,
            grid=grid,
            in_specs=[
                pl.BlockSpec((slabs * H, W), lambda i: (i, 0)),
                pl.BlockSpec((W, n_channels), lambda i: (0, 0)),
                pl.BlockSpec((n_channels, hidden), lambda i: (0, 0)),
                pl.BlockSpec((1, hidden), lambda i: (0, 0)),
                pl.BlockSpec((hidden, n_channels), lambda i: (0, 0)),
                pl.BlockSpec((1, n_channels), lambda i: (0, 0)),
            ],
            out_specs=pl.BlockSpec((slabs, H, n_channels), lambda i: (i, 0, 0)),
        ),
        compiler_params=pltpu.CompilerParams(
            dimension_semantics=("parallel",),
            vmem_limit_bytes=32 * 1024 * 1024,
        ),
    )(x2d, a_w, w1t, b1r, w2t, b2r)
    return out.reshape(N, C, H, n_channels)


def reference(in_block, w1, b1, w2, b2, frame_size):
    """Pure-JAX mirror of the PyTorch module's forward."""
    fs = frame_size
    x = jax.lax.reduce_window(
        in_block, 0.0, jax.lax.add,
        window_dimensions=(1, 1, fs, fs),
        window_strides=(1, 1, fs, fs),
        padding='VALID') / float(fs * fs)
    s = jnp.maximum(jnp.einsum('ncha,oa->ncho', x, w1) + b1, 0.0)
    gate = jax.nn.sigmoid(jnp.einsum('ncho,po->nchp', s, w2) + b2)
    return jnp.einsum('nchw,ncwp->nchp', in_block, gate)


if __name__ == "__main__":
    # Shapes implied by the forward pass:
    #   n_channels = 8, frame_size = 2, ratio = 2  ->  W = 16, H = 32
    N, C = 2, 4
    frame_size = 2
    n_channels = 8
    ratio = 2
    hidden = n_channels // ratio
    W = n_channels * frame_size            # 16
    H = W * frame_size                     # 32

    key = jax.random.PRNGKey(0)
    kx, k1, k2, k3, k4 = jax.random.split(key, 5)
    x = jax.random.normal(kx, (N, C, H, W), jnp.float32)

    # PyTorch nn.Linear default init: U(-1/sqrt(fan_in), +1/sqrt(fan_in))
    bound1 = 1.0 / (n_channels ** 0.5)
    w1 = jax.random.uniform(k1, (hidden, n_channels), jnp.float32, -bound1, bound1)
    b1 = jax.random.uniform(k2, (hidden,), jnp.float32, -bound1, bound1)
    bound2 = 1.0 / (hidden ** 0.5)
    w2 = jax.random.uniform(k3, (n_channels, hidden), jnp.float32, -bound2, bound2)
    b2 = jax.random.uniform(k4, (n_channels,), jnp.float32, -bound2, bound2)

    out = jax.block_until_ready(squeeze_excite_forward(x, w1, b1, w2, b2, frame_size))
    assert out.shape == (N, C, H, n_channels), out.shape

    ref = jax.block_until_ready(reference(x, w1, b1, w2, b2, frame_size))
    assert jnp.allclose(out, ref, rtol=1e-4, atol=1e-4), float(
        jnp.max(jnp.abs(out - ref)))

    print("KERNEL_OK")
</pallas_src>

<mosaic_0001>
module attributes {stable_mosaic.version = 11 : i64} {
  func.func @_se_kernel(%arg0: i32, %arg1: memref<128x16xf32, #tpu.memory_space<vmem>>, %arg2: memref<16x8xf32, #tpu.memory_space<vmem>>, %arg3: memref<8x4xf32, #tpu.memory_space<vmem>>, %arg4: memref<1x4xf32, #tpu.memory_space<vmem>>, %arg5: memref<4x8xf32, #tpu.memory_space<vmem>>, %arg6: memref<1x8xf32, #tpu.memory_space<vmem>>, %arg7: memref<4x32x8xf32, #tpu.memory_space<vmem>>) attributes {dimension_semantics = [#tpu.dimension_semantics<parallel>], iteration_bounds = array<i64: 2>, scalar_prefetch = 0 : i64, scratch_operands = 0 : i64, tpu.core_type = #tpu.core_type<tc>, window_params = [{transform_indices = @transform_0, window_bounds = array<i64: 128, 16>}, {pipeline_mode = #tpu.pipeline_mode<synchronous>, transform_indices = @transform_1, window_bounds = array<i64: 16, 8>}, {pipeline_mode = #tpu.pipeline_mode<synchronous>, transform_indices = @transform_2, window_bounds = array<i64: 8, 4>}, {pipeline_mode = #tpu.pipeline_mode<synchronous>, transform_indices = @transform_3, window_bounds = array<i64: 1, 4>}, {pipeline_mode = #tpu.pipeline_mode<synchronous>, transform_indices = @transform_4, window_bounds = array<i64: 4, 8>}, {pipeline_mode = #tpu.pipeline_mode<synchronous>, transform_indices = @transform_5, window_bounds = array<i64: 1, 8>}, {transform_indices = @transform_6, window_bounds = array<i64: 4, 32, 8>}]} {
    %c0 = arith.constant 0 : index
    %c0_0 = arith.constant 0 : index
    %0 = tpu.strided_load %arg1[%c0, %c0_0] {strides = array<i32: 2, 1>} : memref<128x16xf32, #tpu.memory_space<vmem>>, vector<64x16xf32>
    %c1 = arith.constant 1 : index
    %c0_1 = arith.constant 0 : index
    %1 = tpu.strided_load %arg1[%c1, %c0_1] {strides = array<i32: 2, 1>} : memref<128x16xf32, #tpu.memory_space<vmem>>, vector<64x16xf32>
    %2 = arith.addf %0, %1 : vector<64x16xf32>
    %c0_2 = arith.constant 0 : index
    %c0_3 = arith.constant 0 : index
    %3 = vector.load %arg2[%c0_2, %c0_3] : memref<16x8xf32, #tpu.memory_space<vmem>>, vector<16x8xf32>
    %cst = arith.constant dense<0.000000e+00> : vector<64x8xf32>
    %4 = tpu.matmul %2, %3, %cst {dimension_numbers = #tpu.dot_dimension_numbers<[1], [0], [0], [1], [0, 0, 1, 1], [], []>} : vector<64x16xf32>, vector<16x8xf32>, vector<64x8xf32> -> vector<64x8xf32>
    %c0_4 = arith.constant 0 : index
    %c0_5 = arith.constant 0 : index
    %5 = vector.load %arg3[%c0_4, %c0_5] : memref<8x4xf32, #tpu.memory_space<vmem>>, vector<8x4xf32>
    %cst_6 = arith.constant dense<0.000000e+00> : vector<64x4xf32>
    %6 = tpu.matmul %4, %5, %cst_6 {dimension_numbers = #tpu.dot_dimension_numbers<[1], [0], [0], [1], [0, 0, 1, 1], [], []>} : vector<64x8xf32>, vector<8x4xf32>, vector<64x4xf32> -> vector<64x4xf32>
    %c0_7 = arith.constant 0 : index
    %c0_8 = arith.constant 0 : index
    %7 = vector.load %arg4[%c0_7, %c0_8] : memref<1x4xf32, #tpu.memory_space<vmem>>, vector<1x4xf32>
    %8 = vector.broadcast %7 : vector<1x4xf32> to vector<64x4xf32>
    %9 = arith.addf %6, %8 : vector<64x4xf32>
    %cst_9 = arith.constant 0.000000e+00 : f32
    %10 = vector.broadcast %cst_9 : f32 to vector<64x4xf32>
    %11 = arith.maximumf %9, %10 : vector<64x4xf32>
    %c0_10 = arith.constant 0 : index
    %c0_11 = arith.constant 0 : index
    %12 = vector.load %arg5[%c0_10, %c0_11] : memref<4x8xf32, #tpu.memory_space<vmem>>, vector<4x8xf32>
    %cst_12 = arith.constant dense<0.000000e+00> : vector<64x8xf32>
    %13 = tpu.matmul %11, %12, %cst_12 {dimension_numbers = #tpu.dot_dimension_numbers<[1], [0], [0], [1], [0, 0, 1, 1], [], []>} : vector<64x4xf32>, vector<4x8xf32>, vector<64x8xf32> -> vector<64x8xf32>
    %c0_13 = arith.constant 0 : index
    %c0_14 = arith.constant 0 : index
    %14 = vector.load %arg6[%c0_13, %c0_14] : memref<1x8xf32, #tpu.memory_space<vmem>>, vector<1x8xf32>
    %15 = vector.broadcast %14 : vector<1x8xf32> to vector<64x8xf32>
    %16 = arith.addf %13, %15 : vector<64x8xf32>
    %cst_15 = arith.constant 0.000000e+00 : f32
    %17 = vector.broadcast %cst_15 : f32 to vector<64x8xf32>
    %18 = arith.subf %17, %16 : vector<64x8xf32>
    %19 = math.exp %18 : vector<64x8xf32>
    %cst_16 = arith.constant 1.000000e+00 : f32
    %20 = vector.broadcast %cst_16 : f32 to vector<64x8xf32>
    %21 = arith.addf %20, %19 : vector<64x8xf32>
    %22 = tpu.reciprocal %21 : vector<64x8xf32> -> vector<64x8xf32>
    %23 = vector.shape_cast %22 : vector<64x8xf32> to vector<4x16x8xf32>
    %c0_17 = arith.constant 0 : index
    %c0_18 = arith.constant 0 : index
    %24 = vector.load %arg1[%c0_17, %c0_18] : memref<128x16xf32, #tpu.memory_space<vmem>>, vector<128x16xf32>
    %25 = vector.shape_cast %24 : vector<128x16xf32> to vector<4x32x16xf32>
    "tpu.trace_start"() <{level = 10 : i32, message = "bhw,bwn->bhn"}> : () -> ()
    %cst_19 = arith.constant dense<0.000000e+00> : vector<4x32x8xf32>
    %26 = tpu.matmul %25, %23, %cst_19 {dimension_numbers = #tpu.dot_dimension_numbers<[2], [1], [1], [2], [0, 0, 0, 1, 1, 2], [0], [0]>} : vector<4x32x16xf32>, vector<4x16x8xf32>, vector<4x32x8xf32> -> vector<4x32x8xf32>
    "tpu.trace_stop"() : () -> ()
    %c0_20 = arith.constant 0 : index
    %c0_21 = arith.constant 0 : index
    %c0_22 = arith.constant 0 : index
    %27 = vector.load %arg7[%c0_20, %c0_21, %c0_22] : memref<4x32x8xf32, #tpu.memory_space<vmem>>, vector<4x32x8xf32>
    tpu.vector_store %arg7[%c0_20, %c0_21, %c0_22], %26 {strides = array<i32>} : memref<4x32x8xf32, #tpu.memory_space<vmem>>, vector<4x32x8xf32>,
    return
  }
  func.func @transform_0(%arg0: i32) -> (i32, i32) {
    %c0_i32 = arith.constant 0 : i32
    %c0_i32_0 = arith.constant 0 : i32
    return %arg0, %c0_i32 : i32, i32
  }
  func.func @transform_1(%arg0: i32) -> (i32, i32) {
    %c0_i32 = arith.constant 0 : i32
    %c0_i32_0 = arith.constant 0 : i32
    %c0_i32_1 = arith.constant 0 : i32
    return %c0_i32, %c0_i32_0 : i32, i32
  }
  func.func @transform_2(%arg0: i32) -> (i32, i32) {
    %c0_i32 = arith.constant 0 : i32
    %c0_i32_0 = arith.constant 0 : i32
    %c0_i32_1 = arith.constant 0 : i32
    return %c0_i32, %c0_i32_0 : i32, i32
  }
  func.func @transform_3(%arg0: i32) -> (i32, i32) {
    %c0_i32 = arith.constant 0 : i32
    %c0_i32_0 = arith.constant 0 : i32
    %c0_i32_1 = arith.constant 0 : i32
    return %c0_i32, %c0_i32_0 : i32, i32
  }
  func.func @transform_4(%arg0: i32) -> (i32, i32) {
    %c0_i32 = arith.constant 0 : i32
    %c0_i32_0 = arith.constant 0 : i32
    %c0_i32_1 = arith.constant 0 : i32
    return %c0_i32, %c0_i32_0 : i32, i32
  }
  func.func @transform_5(%arg0: i32) -> (i32, i32) {
    %c0_i32 = arith.constant 0 : i32
    %c0_i32_0 = arith.constant 0 : i32
    %c0_i32_1 = arith.constant 0 : i32
    return %c0_i32, %c0_i32_0 : i32, i32
  }
  func.func @transform_6(%arg0: i32) -> (i32, i32, i32) {
    %c0_i32 = arith.constant 0 : i32
    %c0_i32_0 = arith.constant 0 : i32
    %c0_i32_1 = arith.constant 0 : i32
    return %arg0, %c0_i32, %c0_i32_0 : i32, i32, i32
  }
}

</mosaic_0001>

<bundles_post_ra>
// kernel: tpu_custom_call.1
= control target key start
LH: loop header
LB: loop body
LE: loop exit
PB: predicated region body
PF: predicated region fallthrough
CT: control target
= control target key end

     0   :  { %s1072_s21 = smov 0   ;;  %s1282_s0 = inlined_call_operand.vmem [shape: f32[256,16], index: 0, kind: input, shape index: {}]   ;;  %s1283_s1 = inlined_call_operand.vmem [shape: f32[16,8], index: 1, kind: input, shape index: {}]   ;;  %s1284_s2 = inlined_call_operand.vmem [shape: f32[8,4], index: 2, kind: input, shape index: {}]   ;;  %s1285_s3 = inlined_call_operand.vmem [shape: f32[1,4], index: 3, kind: input, shape index: {}]   ;;  %s1286_s4 = inlined_call_operand.vmem [shape: f32[4,8], index: 4, kind: input, shape index: {}]   ;;  %s1287_s5 = inlined_call_operand.vmem [shape: f32[1,8], index: 5, kind: input, shape index: {}]   ;;  %s1288_s6 = inlined_call_operand.vmem [shape: f32[8,32,8], index: 6, kind: output, shape index: {}]  }
   0x1 LB: > { %s916_s22 = sadd.s32 4294967295, %s1035_s21   ;;  %p920_p0 = scmp.ge.s32.totalorder %s1035_s21, 1  ;;  %s1035_s21 = sphi %s1072_s21, %s16_s21  }
   0x2   : > { %p213_p1 = scmp.lt.s32.totalorder %s1035_s21, 3 }
   0x4   : > { %p214_p2 = pnand %p920_p0, %p213_p1 }
   0x5   : > { %s921_s27 = sshll.u32 (!%p214_p2), %s916_s22, 4  ;;  %s923_s16 = sshll.u32 (!%p214_p2), %s916_s22, 2 }
   0x6   : > { %217 = sbr.rel (%p214_p2) target bundleno = 653 (0x28d), region = 44  ;;  %p245_p3 = scmp.lt.s32.totalorder (!%p214_p2), %s921_s27, 31 }
   0x7   : > { %p251_p4 = scmp.lt.s32.totalorder (!%p214_p2), %s923_s16, 7 }
   0xb   : > { %v297_v0 = vld [vmem:[%s1283_s1 + $0x8] sm:$0xff]  ;;  %v296_v1 = vld [vmem:[%s1283_s1] sm:$0xff]  ;;  %s1296_s27 = smov (!%p245_p3, %s921_s27), 31  ;;  %vm298_vm0 = vcmask 130048   ;;  %vm369_vm1 = vcmask 64512   ;;  %vm473_vm2 = vcmask 1043456  }
   0xc   : > { %337 = vmatpush.msra.mxu0 %v297_v0  ;;  %s922_s28 = sshll.u32 %s1296_s27, 3  ;;  %v364_v14 = vld [vmem:[%s1284_s2] sm:$0xff]  ;;  %vm448_vm3 = vcmask 31744   ;;  %s1298_s16 = smov (!%p251_p4, %s923_s16), 7 }
   0xd   : > { %s1091_s7 = scalar_lea.vmem %s1282_s0, %s922_s28  ;;  %985 = vmatpush.msra.mxu1 %v364_v14  ;;  %v443_v35 = vld [vmem:[%s1286_s4] sm:$0xf]  ;;  %s984_s17 = sshll.u32 %s1298_s16, 5 }
   0xe   : > { %338 = vmatpush.msra.mxu0 %v296_v1  ;;  %v257_v2 = vld [vmem:[%s1091_s7] ss:$2 sm:$0xff]  ;;  %v933_v3 = vld [vmem:[%s1091_s7 + $0x1] ss:$2 sm:$0xff]  ;;  %v926_v5 = vld [vmem:[%s1091_s7 + $0x10] ss:$2 sm:$0xff]  ;;  %957 = vmatpush.msk.msra.mxu2 %vm473_vm2, %v443_v35  ;;  %s1245_s20 = scalar_lea.vmem %s1288_s6, %s984_s17 }
   0xf   : > { %v288_v4 = vadd.f32 %v933_v3, %v257_v2  ;;  %v934_v6 = vld [vmem:[%s1091_s7 + $0x11] ss:$2 sm:$0xff]  ;;  %v927_v8 = vld [vmem:[%s1091_s7 + $0x20] ss:$2 sm:$0xff]  ;;  %v935_v9 = vld [vmem:[%s1091_s7 + $0x21] ss:$2 sm:$0xff]  ;;  %986 = vmatpush.msk.msra.mxu3 %vm473_vm2, %v443_v35 }
  0x10   : > { %v289_v7 = vadd.f32 %v934_v6, %v926_v5  ;;  %v290_v10 = vadd.f32 %v935_v9, %v927_v8  ;;  %v928_v11 = vld [vmem:[%s1091_s7 + $0x30] ss:$2 sm:$0xff]  ;;  %v936_v12 = vld [vmem:[%s1091_s7 + $0x31] ss:$2 sm:$0xff]  ;;  %v929_v15 = vld [vmem:[%s1091_s7 + $0x40] ss:$2 sm:$0xff]  ;;  %409 = vmatpush.msrb.mxu0 %v364_v14 }
  0x11   : > { %941 = vmatmul.msk.f32.vlgmr.msra.gmra.mxu0 %vm298_vm0, %v288_v4  ;;  %v291_v13 = vadd.f32 %v936_v12, %v928_v11  ;;  %v937_v16 = vld [vmem:[%s1091_s7 + $0x41] ss:$2 sm:$0xff]  ;;  %v930_v18 = vld [vmem:[%s1091_s7 + $0x50] ss:$2 sm:$0xff]  ;;  %v938_v19 = vld [vmem:[%s1091_s7 + $0x51] ss:$2 sm:$0xff] }
  0x12   : > { %v292_v17 = vadd.f32 %v937_v16, %v929_v15  ;;  %v293_v20 = vadd.f32 %v938_v19, %v930_v18  ;;  %v931_v21 = vld [vmem:[%s1091_s7 + $0x60] ss:$2 sm:$0xff]  ;;  %v939_v22 = vld [vmem:[%s1091_s7 + $0x61] ss:$2 sm:$0xff]  ;;  %v932_v24 = vld [vmem:[%s1091_s7 + $0x70] ss:$2 sm:$0xff] }
  0x13   : > { %v294_v23 = vadd.f32 %v939_v22, %v931_v21  ;;  %v940_v25 = vld [vmem:[%s1091_s7 + $0x71] ss:$2 sm:$0xff]  ;;  %v995_v36 = vld [vmem:[%s1285_s3] ss:$0 sm:$0xff] }
  0x14   : > { %v295_v26 = vadd.f32 %v940_v25, %v932_v24  ;;  %v1145_v61 = vld [vmem:[%s1287_s5] ss:$0 sm:$0xff] }
  0x19   : > { %942 = vmatmul.msk.f32.gmra.mxu0 %vm298_vm0, %v289_v7 }
  0x21   : > { %943 = vmatmul.msk.f32.gmra.mxu0 %vm298_vm0, %v290_v10 }
  0x29   : > { %944 = vmatmul.msk.f32.gmra.mxu0 %vm298_vm0, %v291_v13 }
  0x31   : > { %945 = vmatmul.msk.f32.gmra.mxu0 %vm298_vm0, %v292_v17 }
  0x39   : > { %946 = vmatmul.msk.f32.gmra.mxu0 %vm298_vm0, %v293_v20 }
  0x41   : > { %947 = vmatmul.msk.f32.gmra.mxu0 %vm298_vm0, %v294_v23 }
  0x49   : > { %948 = vmatmul.msk.f32.gmra.mxu0 %vm298_vm0, %v295_v26 }
  0x8e   : > { %v340_v27 = vpop.f32.mrf.mxu0 }
  0x8f   : > { %949 = vmatmul.msk.f32.vlgmr.msrb.gmra.mxu0 %vm369_vm1, %v340_v27 }
  0x96   : > { %v343_v28 = vpop.f32.mrf.mxu0 }
  0x97   : > { %950 = vmatmul.msk.f32.gmra.mxu0 %vm369_vm1, %v343_v28 }
  0x9e   : > { %v346_v29 = vpop.f32.mrf.mxu0 }
  0x9f   : > { %951 = vmatmul.msk.f32.vlgmr.msra.gmra.mxu1 %vm369_vm1, %v346_v29 }
  0xa6   : > { %v349_v30 = vpop.f32.mrf.mxu0 }
  0xa7   : > { %952 = vmatmul.msk.f32.gmra.mxu1 %vm369_vm1, %v349_v30 }
  0xae   : > { %v352_v31 = vpop.f32.mrf.mxu0 }
  0xaf   : > { %953 = vmatmul.msk.f32.gmra.mxu1 %vm369_vm1, %v352_v31 }
  0xb6   : > { %v355_v32 = vpop.f32.mrf.mxu0 }
  0xb7   : > { %954 = vmatmul.msk.f32.gmra.mxu1 %vm369_vm1, %v355_v32 }
  0xbe   : > { %v358_v33 = vpop.f32.mrf.mxu0 }
  0xbf   : > { %955 = vmatmul.msk.f32.gmra.mxu1 %vm369_vm1, %v358_v33 }
  0xc6   : > { %v361_v34 = vpop.f32.mrf.mxu0 }
  0xc7   : > { %956 = vmatmul.msk.f32.gmra.mxu1 %vm369_vm1, %v361_v34 }
 0x10c   : > { %v411_v37 = vpop.f32.mrf.mxu0 }
 0x10d   : > { %v412_v38 = vadd.f32 %v995_v36, %v411_v37 }
 0x10f   : > { %v435_v39 = vmax.f32 %v412_v38, 0.0 }
 0x111   : > { %958 = vmatmul.msk.f32.vlgmr.msra.gmra.mxu2 %vm448_vm3, %v435_v39 }
 0x114   : > { %v414_v40 = vpop.f32.mrf.mxu0 }
 0x115   : > { %v415_v41 = vadd.f32 %v995_v36, %v414_v40 }
 0x117   : > { %v436_v42 = vmax.f32 %v415_v41, 0.0 }
 0x119   : > { %959 = vmatmul.msk.f32.gmra.mxu2 %vm448_vm3, %v436_v42 }
 0x11c   : > { %v417_v43 = vpop.f32.mrf.mxu1 }
 0x11d   : > { %v418_v44 = vadd.f32 %v995_v36, %v417_v43 }
 0x11f   : > { %v437_v45 = vmax.f32 %v418_v44, 0.0 }
 0x121   : > { %960 = vmatmul.msk.f32.gmra.mxu2 %vm448_vm3, %v437_v45 }
 0x124   : > { %v420_v46 = vpop.f32.mrf.mxu1 }
 0x125   : > { %v421_v47 = vadd.f32 %v995_v36, %v420_v46 }
 0x127   : > { %v438_v48 = vmax.f32 %v421_v47, 0.0 }
 0x129   : > { %961 = vmatmul.msk.f32.gmra.mxu2 %vm448_vm3, %v438_v48 }
 0x12c   : > { %v423_v49 = vpop.f32.mrf.mxu1 }
 0x12d   : > { %v424_v50 = vadd.f32 %v995_v36, %v423_v49 }
 0x12f   : > { %v439_v51 = vmax.f32 %v424_v50, 0.0  ;;  %v662_v50 = vld [vmem:[%s1091_s7] sm:$0xff] }
 0x131   : > { %962 = vmatmul.msk.f32.gmra.mxu2 %vm448_vm3, %v439_v51 }
 0x134   : > { %v426_v52 = vpop.f32.mrf.mxu1 }
 0x135   : > { %v427_v53 = vadd.f32 %v995_v36, %v426_v52 }
 0x137   : > { %v440_v54 = vmax.f32 %v427_v53, 0.0 }
 0x139   : > { %963 = vmatmul.msk.f32.gmra.mxu2 %vm448_vm3, %v440_v54 }
 0x13c   : > { %v429_v55 = vpop.f32.mrf.mxu1 }
 0x13d   : > { %v430_v56 = vadd.f32 %v995_v36, %v429_v55 }
 0x13f   : > { %v441_v57 = vmax.f32 %v430_v56, 0.0 }
 0x141   : > { %964 = vmatmul.msk.f32.vlgmr.msra.gmra.mxu3 %vm448_vm3, %v441_v57 }
 0x144   : > { %v432_v58 = vpop.f32.mrf.mxu1 }
 0x145   : > { %v433_v59 = vadd.f32 %v995_v36, %v432_v58 }
 0x147   : > { %v442_v60 = vmax.f32 %v433_v59, 0.0 }
 0x149   : > { %965 = vmatmul.msk.f32.gmra.mxu3 %vm448_vm3, %v442_v60 }
 0x194   : > { %v494_v62 = vpop.f32.mrf.mxu2 }
 0x195   : > { %v495_v63 = vadd.f32 %v1145_v61, %v494_v62 }
 0x197   : > { %v518_v0 = vsub.f32 0.0, %v495_v63 }
 0x199   : > { %v526_v1 = vmul.f32 1.442695, %v518_v0  ;;  %v663_v0 = vld [vmem:[%s1091_s7 + $0x8] sm:$0xff] }
 0x19b   : > { %997 = vpow2.f32 %v526_v1 }
 0x19c   : > { %v497_v2 = vpop.f32.mrf.mxu2 }
 0x19d   : > { %v498_v3 = vadd.f32 %v1145_v61, %v497_v2 }
 0x19f   : > { %v519_v4 = vsub.f32 0.0, %v498_v3 }
 0x1a1   : > { %v998_v5 = vpop.eup %997  ;;  %v528_v6 = vmul.f32 1.442695, %v519_v4 }
 0x1a2   : > { %v542_v7 = vadd.f32 1.0, %v998_v5 }
 0x1a3   : > { %999 = vpow2.f32 %v528_v6 }
 0x1a4   : > { %1001 = vrcp.f32 %v542_v7  ;;  %v500_v8 = vpop.f32.mrf.mxu2  ;;  %vm555_vm6 = vweird.f32 %v542_v7  ;;  %v561_v34 = vand.u32 2147483648, %v542_v7  ;;  %v559_v39 = vand.u32 2147483647, %v542_v7 }
 0x1a5   : > { %v501_v9 = vadd.f32 %v1145_v61, %v500_v8 }
 0x1a6   : > { %v562_v48 = vor.u32 1.1754944e-38, %v561_v34  ;;  %vm560_vm11 = vcmp.eq.f32.partialorder %v559_v39, 8.507059e+37 }
 0x1a7   : > { %v520_v10 = vsub.f32 0.0, %v501_v9 }
 0x1a9   : > { %v1000_v11 = vpop.eup %999  ;;  %v530_v12 = vmul.f32 1.442695, %v520_v10  ;;  %v668_v10 = vld [vmem:[%s1091_s7 + $0x30] sm:$0xff] }
 0x1aa   : > { %v1002_v13 = vpop.eup %1001  ;;  %v543_v14 = vadd.f32 1.0, %v1000_v11 }
 0x1ab   : > { %1003 = vpow2.f32 %v530_v12  ;;  %v551_v15 = vmul.f32 %v1002_v13, %v542_v7  ;;  %vm556_vm4 = vweird.f32 %v1002_v13 }
 0x1ac   : > { %1005 = vrcp.f32 %v543_v14  ;;  %v503_v16 = vpop.f32.mrf.mxu2  ;;  %v573_v29 = vand.u32 2147483647, %v543_v14  ;;  %v575_v30 = vand.u32 2147483648, %v543_v14  ;;  %vm569_vm7 = vweird.f32 %v543_v14  ;;  %vm1155_vm8 = vmor %vm555_vm6, %vm556_vm4 }
 0x1ad   : > { %v504_v17 = vadd.f32 %v1145_v61, %v503_v16  ;;  %v552_v19 = vsub.f32 1.0, %v551_v15 }
 0x1ae   : > { %vm574_vm10 = vcmp.eq.f32.partialorder %v573_v29, 8.507059e+37  ;;  %v576_v42 = vor.u32 1.1754944e-38, %v575_v30 }
 0x1af   : > { %v521_v18 = vsub.f32 0.0, %v504_v17  ;;  %v553_v25 = vmul.f32 %v1002_v13, %v552_v19 }
 0x1b1   : > { %v1004_v20 = vpop.eup %1003  ;;  %v532_v21 = vmul.f32 1.442695, %v521_v18  ;;  %v554_v33 = vadd.f32 %v1002_v13, %v553_v25 }
 0x1b2   : > { %v1006_v22 = vpop.eup %1005  ;;  %v1151_v23 = vadd.f32 1.0, %v1004_v20 }
 0x1b3   : > { %1007 = vpow2.f32 %v532_v21  ;;  %v565_v24 = vmul.f32 %v1006_v22, %v543_v14  ;;  %vm570_vm5 = vweird.f32 %v1006_v22  ;;  %v558_v44 = vsel %vm1155_vm8, %v1002_v13, %v554_v33 }
 0x1b4   : > { %1009 = vrcp.f32 %v1151_v23  ;;  %v506_v26 = vpop.f32.mrf.mxu2  ;;  %vm571_vm9 = vmor %vm569_vm7, %vm570_vm5  ;;  %v563_v51 = vsel %vm560_vm11, %v562_v48, %v558_v44  ;;  %vm583_vm14 = vweird.f32 %v1151_v23  ;;  %v589_v6 = vand.u32 2147483648, %v1151_v23 }
 0x1b5   : > { %v507_v27 = vadd.f32 %v1145_v61, %v506_v26  ;;  %v566_v28 = vsub.f32 1.0, %v565_v24  ;;  %v587_v11 = vand.u32 2147483647, %v1151_v23 }
 0x1b6   : > { %v590_v20 = vor.u32 1.1754944e-38, %v589_v6 }
 0x1b7   : > { %v522_v31 = vsub.f32 0.0, %v507_v27  ;;  %v567_v32 = vmul.f32 %v1006_v22, %v566_v28  ;;  %vm588_vm5 = vcmp.eq.f32.partialorder %v587_v11, 8.507059e+37 }
 0x1b9   : > { %v1008_v35 = vpop.eup %1007  ;;  %v534_v36 = vmul.f32 1.442695, %v522_v31  ;;  %v568_v37 = vadd.f32 %v1006_v22, %v567_v32  ;;  %v665_v32 = vld [vmem:[%s1091_s7 + $0x18] sm:$0xff] }
 0x1ba   : > { %v1159_v40 = vpop.eup %1009  ;;  %v545_v41 = vadd.f32 1.0, %v1008_v35 }
 0x1bb   : > { %1011 = vpow2.f32 %v534_v36  ;;  %v572_v43 = vsel %vm571_vm9, %v1006_v22, %v568_v37  ;;  %v579_v45 = vmul.f32 %v1159_v40, %v1151_v23  ;;  %vm584_vm12 = vweird.f32 %v1159_v40  ;;  %v664_v22 = vld [vmem:[%s1091_s7 + $0x10] sm:$0xff] }
 0x1bc   : > { %1013 = vrcp.f32 %v545_v41  ;;  %v509_v46 = vpop.f32.mrf.mxu2  ;;  %v577_v47 = vsel %vm574_vm10, %v576_v42, %v572_v43  ;;  %v601_v1 = vand.u32 2147483647, %v545_v41  ;;  %v603_v2 = vand.u32 2147483648, %v545_v41  ;;  %vm1179_vm2 = vmor %vm583_vm14, %vm584_vm12 }
 0x1bd   : > { %v510_v49 = vadd.f32 %v1145_v61, %v509_v46  ;;  %704 = vmatpush.msrb.mxu3 %v577_v47  ;;  %v580_v53 = vsub.f32 1.0, %v579_v45  ;;  %vm597_vm15 = vweird.f32 %v545_v41 }
 0x1be   : > { %vm602_vm4 = vcmp.eq.f32.partialorder %v601_v1, 8.507059e+37  ;;  %v604_v14 = vor.u32 1.1754944e-38, %v603_v2 }
 0x1bf   : > { %v523_v52 = vsub.f32 0.0, %v510_v49  ;;  %705 = vmatpush.msrb.mxu3 %v563_v51  ;;  %v581_v59 = vmul.f32 %v1159_v40, %v580_v53  ;;  %v670_v51 = vld [vmem:[%s1091_s7 + $0x40] sm:$0xff] }
 0x1c0   : > { %966 = vmatmul.msk.f32.vlgmr.msrb.gmra.mxu3 %vm298_vm0, %v662_v50  ;;  %v666_v50 = vld [vmem:[%s1091_s7 + $0x20] sm:$0xff] }
 0x1c1   : > { %v1012_v54 = vpop.eup %1011  ;;  %v536_v55 = vmul.f32 1.442695, %v523_v52  ;;  %v582_v5 = vadd.f32 %v1159_v40, %v581_v59  ;;  %v671_v59 = vld [vmem:[%s1091_s7 + $0x48] sm:$0xff] }
 0x1c2   : > { %v1014_v56 = vpop.eup %1013  ;;  %v1168_v57 = vadd.f32 1.0, %v1012_v54 }
 0x1c3   : > { %1015 = vpow2.f32 %v536_v55  ;;  %v593_v58 = vmul.f32 %v1014_v56, %v545_v41  ;;  %vm598_vm13 = vweird.f32 %v1014_v56  ;;  %v586_v16 = vsel %vm1179_vm2, %v1159_v40, %v582_v5 }
 0x1c4   : > { %1017 = vrcp.f32 %v1168_v57  ;;  %v512_v60 = vpop.f32.mrf.mxu3  ;;  %vm599_vm3 = vmor %vm597_vm15, %vm598_vm13  ;;  %v591_v23 = vsel %vm588_vm5, %v590_v20, %v586_v16  ;;  %vm611_vm8 = vweird.f32 %v1168_v57  ;;  %v617_v37 = vand.u32 2147483648, %v1168_v57  ;;  %v676_v16 = vld [vmem:[%s1091_s7 + $0x70] sm:$0xff] }
 0x1c5   : > { %v513_v62 = vadd.f32 %v1145_v61, %v512_v60  ;;  %v594_v63 = vsub.f32 1.0, %v593_v58  ;;  %v615_v41 = vand.u32 2147483647, %v1168_v57  ;;  %v667_v58 = vld [vmem:[%s1091_s7 + $0x28] sm:$0xff] }
 0x1c6   : > { %v618_v49 = vor.u32 1.1754944e-38, %v617_v37 }
 0x1c7   : > { %v524_v3 = vsub.f32 0.0, %v513_v62  ;;  %v595_v4 = vmul.f32 %v1014_v56, %v594_v63  ;;  %vm616_vm13 = vcmp.eq.f32.partialorder %v615_v41, 8.507059e+37 }
 0x1c8   : > { %967 = vmatmul.msk.f32.gmra.mxu3 %vm298_vm0, %v663_v0 }
 0x1c9   : > { %v1016_v7 = vpop.eup %1015  ;;  %v538_v8 = vmul.f32 1.442695, %v524_v3  ;;  %v596_v9 = vadd.f32 %v1014_v56, %v595_v4 }
 0x1ca   : > { %v1184_v12 = vpop.eup %1017  ;;  %v547_v13 = vadd.f32 1.0, %v1016_v7 }
 0x1cb   : > { %1019 = vpow2.f32 %v538_v8  ;;  %v600_v15 = vsel %vm599_vm3, %v1014_v56, %v596_v9  ;;  %v607_v17 = vmul.f32 %v1184_v12, %v1168_v57  ;;  %vm612_vm6 = vweird.f32 %v1184_v12  ;;  %v674_v9 = vld [vmem:[%s1091_s7 + $0x60] sm:$0xff] }
 0x1cc   : > { %1021 = vrcp.f32 %v547_v13  ;;  %v515_v18 = vpop.f32.mrf.mxu3  ;;  %v605_v19 = vsel %vm602_vm4, %v604_v14, %v600_v15  ;;  %v631_v33 = vand.u32 2147483648, %v547_v13  ;;  %v629_v35 = vand.u32 2147483647, %v547_v13  ;;  %vm1204_vm10 = vmor %vm611_vm8, %vm612_vm6  ;;  %v669_v14 = vld [vmem:[%s1091_s7 + $0x38] sm:$0xff] }
 0x1cd   : > { %v516_v21 = vadd.f32 %v1145_v61, %v515_v18  ;;  %745 = vmatpush.msra.mxu3 %v605_v19  ;;  %v608_v25 = vsub.f32 1.0, %v607_v17  ;;  %vm625_vm9 = vweird.f32 %v547_v13  ;;  %v673_v15 = vld [vmem:[%s1091_s7 + $0x58] sm:$0xff] }
 0x1ce   : > { %v632_v44 = vor.u32 1.1754944e-38, %v631_v33  ;;  %vm630_vm12 = vcmp.eq.f32.partialorder %v629_v35, 8.507059e+37  ;;  %v677_v17 = vld [vmem:[%s1091_s7 + $0x78] sm:$0xff] }
 0x1cf   : > { %v525_v24 = vsub.f32 0.0, %v516_v21  ;;  %746 = vmatpush.msra.mxu3 %v591_v23  ;;  %v609_v31 = vmul.f32 %v1184_v12, %v608_v25 }
 0x1d0   : > { %968 = vmatmul.msk.f32.gmra.mxu3 %vm298_vm0, %v664_v22 }
 0x1d1   : > { %v1020_v26 = vpop.eup %1019  ;;  %v540_v27 = vmul.f32 1.442695, %v525_v24  ;;  %v610_v36 = vadd.f32 %v1184_v12, %v609_v31 }
 0x1d2   : > { %v1022_v28 = vpop.eup %1021  ;;  %v1194_v29 = vadd.f32 1.0, %v1020_v26 }
 0x1d3   : > { %1023 = vpow2.f32 %v540_v27  ;;  %v621_v30 = vmul.f32 %v1022_v28, %v547_v13  ;;  %vm626_vm7 = vweird.f32 %v1022_v28  ;;  %v614_v46 = vsel %vm1204_vm10, %v1184_v12, %v610_v36  ;;  %v672_v12 = vld [vmem:[%s1091_s7 + $0x50] sm:$0xff]  ;;  %v675_v13 = vld [vmem:[%s1091_s7 + $0x68] sm:$0xff] }
 0x1d4   : > { %1025 = vrcp.f32 %v1194_v29  ;;  %vm627_vm11 = vmor %vm625_vm9, %vm626_vm7  ;;  %v619_v52 = vsel %vm616_vm13, %v618_v49, %v614_v46  ;;  %vm639_vm2 = vweird.f32 %v1194_v29  ;;  %v645_v1 = vand.u32 2147483648, %v1194_v29 }
 0x1d5   : > { %v622_v61 = vsub.f32 1.0, %v621_v30  ;;  %v643_v3 = vand.u32 2147483647, %v1194_v29 }
 0x1d6   : > { %v646_v8 = vor.u32 1.1754944e-38, %v645_v1 }
 0x1d7   : > { %v623_v34 = vmul.f32 %v1022_v28, %v622_v61  ;;  %vm644_vm7 = vcmp.eq.f32.partialorder %v643_v3, 8.507059e+37 }
 0x1d8   : > { %969 = vmatmul.msk.f32.gmra.mxu3 %vm298_vm0, %v665_v32 }
 0x1d9   : > { %v1024_v38 = vpop.eup %1023  ;;  %v624_v39 = vadd.f32 %v1022_v28, %v623_v34 }
 0x1da   : > { %v1026_v42 = vpop.eup %1025  ;;  %v549_v43 = vadd.f32 1.0, %v1024_v38 }
 0x1db   : > { %v628_v45 = vsel %vm627_vm11, %v1022_v28, %v624_v39  ;;  %v635_v47 = vmul.f32 %v1026_v42, %v1194_v29  ;;  %vm640_vm14 = vweird.f32 %v1026_v42 }
 0x1dc   : > { %1027 = vrcp.f32 %v549_v43  ;;  %v633_v48 = vsel %vm630_vm12, %v632_v44, %v628_v45  ;;  %v659_v60 = vand.u32 2147483648, %v549_v43  ;;  %v657_v63 = vand.u32 2147483647, %v549_v43  ;;  %vm641_vm4 = vmor %vm639_vm2, %vm640_vm14 }
 0x1dd   : > { %786 = vmatpush.msrb.mxu1 %v633_v48  ;;  %v636_v53 = vsub.f32 1.0, %v635_v47  ;;  %vm653_vm3 = vweird.f32 %v549_v43 }
 0x1de   : > { %v660_v4 = vor.u32 1.1754944e-38, %v659_v60  ;;  %vm658_vm6 = vcmp.eq.f32.partialorder %v657_v63, 8.507059e+37 }
 0x1df   : > { %787 = vmatpush.msrb.mxu1 %v619_v52  ;;  %v637_v56 = vmul.f32 %v1026_v42, %v636_v53 }
 0x1e0   : > { %970 = vmatmul.msk.f32.vlgmr.msra.gmra.mxu3 %vm298_vm0, %v666_v50  ;;  %974 = vmatmul.msk.f32.vlgmr.msrb.gmra.mxu1 %vm298_vm0, %v670_v51 }
 0x1e1   : > { %v638_v0 = vadd.f32 %v1026_v42, %v637_v56 }
 0x1e2   : > { %v1028_v54 = vpop.eup %1027 }
 0x1e3   : > { %v649_v55 = vmul.f32 %v1028_v54, %v549_v43  ;;  %vm654_vm15 = vweird.f32 %v1028_v54  ;;  %v642_v6 = vsel %vm641_vm4, %v1026_v42, %v638_v0 }
 0x1e4   : > { %vm655_vm5 = vmor %vm653_vm3, %vm654_vm15  ;;  %v647_v11 = vsel %vm644_vm7, %v646_v8, %v642_v6 }
 0x1e5   : > { %v650_v57 = vsub.f32 1.0, %v649_v55 }
 0x1e7   : > { %v651_v62 = vmul.f32 %v1028_v54, %v650_v57 }
 0x1e8   : > { %971 = vmatmul.msk.f32.gmra.mxu3 %vm298_vm0, %v667_v58  ;;  %975 = vmatmul.msk.f32.gmra.mxu1 %vm298_vm0, %v671_v59 }
 0x1e9   : > { %v652_v2 = vadd.f32 %v1028_v54, %v651_v62 }
 0x1eb   : > { %v656_v5 = vsel %vm655_vm5, %v1028_v54, %v652_v2 }
 0x1ec   : > { %v661_v7 = vsel %vm658_vm6, %v660_v4, %v656_v5 }
 0x1ed   : > { %827 = vmatpush.msrb.mxu2 %v661_v7 }
 0x1ef   : > { %828 = vmatpush.msrb.mxu2 %v647_v11 }
 0x1f0   : > { %978 = vmatmul.msk.f32.vlgmr.msrb.gmra.mxu2 %vm298_vm0, %v674_v9  ;;  %972 = vmatmul.msk.f32.gmra.mxu3 %vm298_vm0, %v668_v10 }
 0x1f1   : > { %976 = vmatmul.msk.f32.gmra.mxu1 %vm298_vm0, %v672_v12 }
 0x1f8   : > { %979 = vmatmul.msk.f32.gmra.mxu2 %vm298_vm0, %v675_v13  ;;  %973 = vmatmul.msk.f32.gmra.mxu3 %vm298_vm0, %v669_v14 }
 0x1f9   : > { %977 = vmatmul.msk.f32.gmra.mxu1 %vm298_vm0, %v673_v15 }
 0x200   : > { %980 = vmatmul.msk.f32.gmra.mxu2 %vm298_vm0, %v676_v16 }
 0x208   : > { %981 = vmatmul.msk.f32.gmra.mxu2 %vm298_vm0, %v677_v17 }
 0x243   : > { %v707_v18 = vpop.f32.mrf.mxu3 }
 0x244   : > { %842 = vst.msk [vmem:[%s1245_s20] sm:$0xff] %vm369_vm1, %v707_v18 }
 0x24b   : > { %v710_v19 = vpop.f32.mrf.mxu3 }
 0x24c   : > { %843 = vst.msk [vmem:[%s1245_s20 + $0x8] sm:$0xff] %vm369_vm1, %v710_v19 }
 0x253   : > { %v713_v20 = vpop.f32.mrf.mxu3 }
 0x254   : > { %844 = vst.msk [vmem:[%s1245_s20 + $0x10] sm:$0xff] %vm369_vm1, %v713_v20 }
 0x25b   : > { %v716_v21 = vpop.f32.mrf.mxu3 }
 0x25c   : > { %845 = vst.msk [vmem:[%s1245_s20 + $0x18] sm:$0xff] %vm369_vm1, %v716_v21 }
 0x25d   : > { %v789_v22 = vpop.f32.mrf.mxu1 }
 0x25e   : > { %850 = vst.msk [vmem:[%s1245_s20 + $0x40] sm:$0xff] %vm369_vm1, %v789_v22 }
 0x263   : > { %v748_v23 = vpop.f32.mrf.mxu3 }
 0x264   : > { %846 = vst.msk [vmem:[%s1245_s20 + $0x20] sm:$0xff] %vm369_vm1, %v748_v23 }
 0x265   : > { %v792_v24 = vpop.f32.mrf.mxu1 }
 0x266   : > { %851 = vst.msk [vmem:[%s1245_s20 + $0x48] sm:$0xff] %vm369_vm1, %v792_v24 }
 0x26b   : > { %v751_v25 = vpop.f32.mrf.mxu3 }
 0x26c   : > { %847 = vst.msk [vmem:[%s1245_s20 + $0x28] sm:$0xff] %vm369_vm1, %v751_v25 }
 0x26e   : > { %v795_v26 = vpop.f32.mrf.mxu1 }
 0x26f   : > { %852 = vst.msk [vmem:[%s1245_s20 + $0x50] sm:$0xff] %vm369_vm1, %v795_v26 }
 0x273   : > { %v830_v27 = vpop.f32.mrf.mxu2  ;;  %v754_v28 = vpop.f32.mrf.mxu3 }
 0x274   : > { %854 = vst.msk [vmem:[%s1245_s20 + $0x60] sm:$0xff] %vm369_vm1, %v830_v27 }
 0x275   : > { %848 = vst.msk [vmem:[%s1245_s20 + $0x30] sm:$0xff] %vm369_vm1, %v754_v28 }
 0x276   : > { %v798_v29 = vpop.f32.mrf.mxu1 }
 0x277   : > { %853 = vst.msk [vmem:[%s1245_s20 + $0x58] sm:$0xff] %vm369_vm1, %v798_v29 }
 0x27b   : > { %v833_v30 = vpop.f32.mrf.mxu2  ;;  %v757_v31 = vpop.f32.mrf.mxu3 }
 0x27c   : > { %855 = vst.msk [vmem:[%s1245_s20 + $0x68] sm:$0xff] %vm369_vm1, %v833_v30 }
 0x27d   : > { %849 = vst.msk [vmem:[%s1245_s20 + $0x38] sm:$0xff] %vm369_vm1, %v757_v31 }
 0x283   : > { %v836_v61 = vpop.f32.mrf.mxu2 }
 0x284   : > { %856 = vst.msk [vmem:[%s1245_s20 + $0x70] sm:$0xff] %vm369_vm1, %v836_v61 }
 0x28b   : > { %v839_v32 = vpop.f32.mrf.mxu2 }
 0x28c   : > { %857 = vst.msk [vmem:[%s1245_s20 + $0x78] sm:$0xff] %vm369_vm1, %v839_v32 }
 0x28d PF: > { %s16_s21 = sadd.s32 1, %s1035_s21  }
 0x28e   : > { %p13_p5 = scmp.ge.s32.totalorder %s16_s21, 4  }
 0x290   :  { %15 = sbr.rel (!%p13_p5) target bundleno = 1 (0x1), region = 89 }

</bundles_post_ra>
